<compile_context>
chip_gen: v6e
topology: v6e:2x2x1
jax: 0.10.0
libtpu: 0.0.40
codegen_flags: <defaults>
</compile_context>

<pallas_src>
import functools
import math

import jax
import jax.numpy as jnp
from jax.experimental import pallas as pl
from jax.experimental.pallas import tpu as pltpu

_MiB = 1024 * 1024


# ---------------------------------------------------------------------------
# Kernels
# ---------------------------------------------------------------------------
def _dense_attn_kernel(q_ref, k_ref, v_ref, o_ref, *, scale_sq, exp_dtype):
    """Whole-sequence attention for one batch of heads.

    q_ref/k_ref/v_ref blocks: [BH, C, T]   o_ref block: [BH, C, T]
    """
    q = q_ref[...]
    k = k_ref[...]
    v = v_ref[...]

    # Reference applies (ch**-0.25) to both q and k; fold scale**2 into q only
    # (touches B*C*T elements instead of the B*T*T f32 score tile).
    qs = q * scale_sq

    # s[b, s, t] = sum_c k[b, c, s] * q[b, c, t]      ('bcs,bct->bst')
    # Only the small [C, T] LHS could be transposed by Mosaic here; the [T, T]
    # tile is never a transposed MXU operand in this kernel.
    s = jax.lax.dot_general(
        k, qs,
        dimension_numbers=(((1,), (1,)), ((0,), (0,))),
        preferred_element_type=jnp.float32)            # [BH, T, T] f32

    # Numerically-stable softmax over the key axis (sublane axis here).
    m = jnp.max(s, axis=1, keepdims=True)              # [BH, 1, T]
    p = jnp.exp((s - m).astype(exp_dtype))             # bf16 exp on v6e/v7x
    l = jnp.sum(p, axis=1, keepdims=True, dtype=jnp.float32)

    # a[b, c, t] = sum_s v[b, c, s] * p[b, s, t]       ('bcs,bst->bct')  -- NN
    a = jax.lax.dot_general(
        v, p.astype(v.dtype),
        dimension_numbers=(((2,), (1,)), ((0,), (0,))),
        preferred_element_type=jnp.float32)             # [BH, C, T] f32

    # Normalize after the matmul: C*T elements instead of T*T, single EUP vrcp.
    o_ref[...] = (a * pl.reciprocal(l, approx=True)).astype(o_ref.dtype)


def _flash_attn_kernel(q_ref, k_ref, v_ref, o_ref, m_ref, l_ref, acc_ref, *,
                       scale_sq, exp_dtype):
    """Key-tiled online-softmax attention for large T.

    q_ref: [BH, C, TQ]  k_ref/v_ref: [BH, C, TK]  o_ref: [BH, C, TQ]
    m_ref/l_ref: [BH, 1, TQ] f32  acc_ref: [BH, C, TQ] f32 (VMEM scratch)
    """
    ki = pl.program_id(2)

    @pl.when(ki == 0)
    def _init():
        m_ref[...] = jnp.full(m_ref.shape, -jnp.inf, m_ref.dtype)
        l_ref[...] = jnp.zeros(l_ref.shape, l_ref.dtype)
        acc_ref[...] = jnp.zeros(acc_ref.shape, acc_ref.dtype)

    q = q_ref[...]
    k = k_ref[...]
    v = v_ref[...]
    qs = q * scale_sq

    s = jax.lax.dot_general(
        k, qs,
        dimension_numbers=(((1,), (1,)), ((0,), (0,))),
        preferred_element_type=jnp.float32)             # [BH, TK, TQ]

    m_prev = m_ref[...]                                 # [BH, 1, TQ]
    m_new = jnp.maximum(m_prev, jnp.max(s, axis=1, keepdims=True))
    alpha = jnp.exp(m_prev - m_new)                     # rescale previous tiles
    p = jnp.exp((s - m_new).astype(exp_dtype))          # [BH, TK, TQ]
    l_ref[...] = alpha * l_ref[...] + jnp.sum(
        p, axis=1, keepdims=True, dtype=jnp.float32)

    pv = jax.lax.dot_general(
        v, p.astype(v.dtype),
        dimension_numbers=(((2,), (1,)), ((0,), (0,))),
        preferred_element_type=jnp.float32)             # [BH, C, TQ]  -- NN
    acc_ref[...] = alpha * acc_ref[...] + pv
    m_ref[...] = m_new

    @pl.when(ki == pl.num_programs(2) - 1)
    def _finalize():
        o_ref[...] = (acc_ref[...] *
                      pl.reciprocal(l_ref[...], approx=True)).astype(o_ref.dtype)


# ---------------------------------------------------------------------------
# Hardware-aware sizing helpers
# ---------------------------------------------------------------------------
def _device_kind():
    try:
        return jax.devices()[0].device_kind.lower()
    except Exception:
        return ""


def _vmem_capacity_bytes(kind):
    try:
        return int(pltpu.get_tpu_info().vmem_capacity_bytes)
    except Exception:
        pass
    if "v7" in kind:
        return 64 * _MiB
    if "v5" in kind or "v6" in kind:
        return 128 * _MiB
    return 64 * _MiB           # unknown part: assume the small-VMEM case


def _pick_exp_dtype(ch, kind):
    # At small per-head C the kernel is EUP(exp)-bound; v6e/v7x have a bf16
    # EUP, so halve the transcendental cost there.  Keep f32 on v5e / unknown.
    if ch <= 128 and ("v6" in kind or "v7" in kind):
        return jnp.bfloat16
    return jnp.float32


def _dense_cost_bytes(bh, ch, t, itemsize):
    io = 2 * bh * 4 * ch * t * itemsize            # dbl-buffered q,k,v in + out blocks
    vals = bh * ch * t * (3 * itemsize + 4)        # loaded q/k/v values + f32 pre-output
    tmps = bh * t * t * (4 + 4 + itemsize)         # f32 scores, exp(p), p cast for MXU
    return io + vals + tmps


def _flash_cost_bytes(bh, ch, tq, tk, itemsize):
    io = 2 * bh * ch * (2 * tq + 2 * tk) * itemsize   # dbl-buffered q,k,v in + out
    scratch = bh * (ch + 2) * tq * 4                  # m, l, acc
    vals = bh * ch * (tq + 2 * tk) * itemsize + bh * ch * tq * 4
    tmps = bh * tk * tq * (4 + 4 + itemsize)
    return io + scratch + vals + tmps


def _pick_block_heads(b, budget, cost_fn, max_bh=32):
    """Largest head batch whose working set fits `budget`, keeping >= 2 grid
    steps (pipelining + both v7x TensorCores busy), preferring an even step
    count and zero tail padding. Non-divisor BH is allowed (padded cdiv grid)."""
    best, best_key = 1, None
    for bh in range(1, min(b, max_bh) + 1):
        if cost_fn(bh) > budget:
            continue
        steps = pl.cdiv(b, bh)
        if b >= 2 and steps < 2:
            continue
        pad = steps * bh - b
        eff_steps = steps + (steps % 2)   # an odd count idles one v7x core a step
        key = (-eff_steps, -pad, bh)
        if best_key is None or key > best_key:
            best, best_key = bh, key
    return best


def _pick_pow2_tile(t, max_tile=256, min_tile=128):
    tile = max_tile
    while tile >= min_tile:
        if t % tile == 0:
            return tile
        tile //= 2
    return None


# ---------------------------------------------------------------------------
# Wrapper
# ---------------------------------------------------------------------------
def qkv_attention(qkv, n_heads, *, block_heads=None, exp_dtype=None,
                  force_flash=False):
    """
    :param qkv: [N, H*3*C, T] array of concatenated Qs, Ks, Vs.
    :return:    [N, H*C, T] array after attention.
    """
    N, width, T = qkv.shape
    assert width % (3 * n_heads) == 0
    ch = width // (3 * n_heads)
    B = N * n_heads
    itemsize = jnp.dtype(qkv.dtype).itemsize

    # Metadata-only reshape; Q/K/V never materialized separately in HBM.
    qkv4 = qkv.reshape(B, 3, ch, T)

    scale = 1.0 / math.sqrt(math.sqrt(ch))
    scale_sq = scale * scale                       # == ch ** -0.5, folded into q

    kind = _device_kind()
    vmem_cap = _vmem_capacity_bytes(kind)
    budget = min(vmem_cap // 2, 64 * _MiB)         # ~32 MiB on v7x, 64 MiB on v5e/v6e
    if exp_dtype is None:
        exp_dtype = _pick_exp_dtype(ch, kind)

    flops = 4 * B * ch * T * T                     # two matmuls
    transcendentals = B * T * T                    # softmax exp
    bytes_accessed = 4 * B * ch * T * itemsize     # packed qkv in + attn out
    cost_est = pl.CostEstimate(flops=flops, transcendentals=transcendentals,
                               bytes_accessed=bytes_accessed)

    use_flash = force_flash or _dense_cost_bytes(1, ch, T, itemsize) > budget
    tq = tk = None
    if use_flash:
        tq = tk = _pick_pow2_tile(T)
        if tq is None:
            # TODO(synk): masked tail key/query tiles for T not a multiple of
            # 128; fall back to the monolithic kernel for such shapes.
            use_flash = False

    if use_flash:
        cost_fn = lambda bh: _flash_cost_bytes(bh, ch, tq, tk, itemsize)
        BH = block_heads or _pick_block_heads(B, budget, cost_fn)
        vmem_limit = int(min(vmem_cap * 5 // 8, max(32 * _MiB, 2 * cost_fn(BH))))
        out = pl.pallas_call(
            functools.partial(_flash_attn_kernel, scale_sq=scale_sq,
                              exp_dtype=exp_dtype),
            out_shape=jax.ShapeDtypeStruct((B, ch, T), qkv.dtype),
            grid=(pl.cdiv(B, BH), T // tq, T // tk),
            in_specs=[
                pl.BlockSpec((BH, None, ch, tq), lambda b, qi, ki: (b, 0, 0, qi)),
                pl.BlockSpec((BH, None, ch, tk), lambda b, qi, ki: (b, 1, 0, ki)),
                pl.BlockSpec((BH, None, ch, tk), lambda b, qi, ki: (b, 2, 0, ki)),
            ],
            out_specs=pl.BlockSpec((BH, ch, tq), lambda b, qi, ki: (b, 0, qi)),
            scratch_shapes=[
                pltpu.VMEM((BH, 1, tq), jnp.float32),    # running max
                pltpu.VMEM((BH, 1, tq), jnp.float32),    # running sum
                pltpu.VMEM((BH, ch, tq), jnp.float32),   # output accumulator
            ],
            compiler_params=pltpu.CompilerParams(
                dimension_semantics=("parallel", "parallel", "arbitrary"),
                vmem_limit_bytes=vmem_limit),
            cost_estimate=cost_est,
        )(qkv4, qkv4, qkv4)
    else:
        cost_fn = lambda bh: _dense_cost_bytes(bh, ch, T, itemsize)
        BH = block_heads or _pick_block_heads(B, budget, cost_fn)
        vmem_limit = int(min(vmem_cap * 5 // 8, max(32 * _MiB, 2 * cost_fn(BH))))
        out = pl.pallas_call(
            functools.partial(_dense_attn_kernel, scale_sq=scale_sq,
                              exp_dtype=exp_dtype),
            out_shape=jax.ShapeDtypeStruct((B, ch, T), qkv.dtype),
            grid=(pl.cdiv(B, BH),),
            in_specs=[
                pl.BlockSpec((BH, None, ch, T), lambda b: (b, 0, 0, 0)),
                pl.BlockSpec((BH, None, ch, T), lambda b: (b, 1, 0, 0)),
                pl.BlockSpec((BH, None, ch, T), lambda b: (b, 2, 0, 0)),
            ],
            out_specs=pl.BlockSpec((BH, ch, T), lambda b: (b, 0, 0)),
            compiler_params=pltpu.CompilerParams(
                dimension_semantics=("parallel",),
                vmem_limit_bytes=vmem_limit),
            cost_estimate=cost_est,
        )(qkv4, qkv4, qkv4)

    return out.reshape(N, n_heads * ch, T)


# ---------------------------------------------------------------------------
# Pure-JAX reference mirroring the PyTorch module
# ---------------------------------------------------------------------------
def _reference(qkv, n_heads):
    N, width, T = qkv.shape
    ch = width // (3 * n_heads)
    qkv_r = qkv.reshape(N * n_heads, 3 * ch, T)
    q, k, v = qkv_r[:, :ch], qkv_r[:, ch:2 * ch], qkv_r[:, 2 * ch:]
    scale = 1.0 / math.sqrt(math.sqrt(ch))
    w = jnp.einsum('bct,bcs->bts', q * scale, k * scale)
    w = jax.nn.softmax(w.astype(jnp.float32), axis=-1).astype(w.dtype)
    a = jnp.einsum('bts,bcs->bct', w, v)
    return a.reshape(N, -1, T)


if __name__ == "__main__":
    root = jax.random.PRNGKey(0)
    k1, k2, k3 = jax.random.split(root, 3)

    # 1) Tiny shape straight from the module spec (width = H*3*C = 24),
    #    forced f32 exp path.
    N, H, C, T = 2, 2, 4, 8
    qkv_small = jax.random.normal(k1, (N, H * 3 * C, T), dtype=jnp.float32)
    out_small = qkv_attention(qkv_small, n_heads=H, exp_dtype=jnp.float32)
    jax.block_until_ready(out_small)
    ref_small = _reference(qkv_small, n_heads=H)
    assert out_small.shape == (N, H * C, T)
    assert jnp.allclose(out_small, ref_small, atol=1e-2, rtol=1e-2)

    # 2) TPU-friendly shape (ch % 8 == 0, T % 128 == 0); auto exp dtype and
    #    head batching (BH > 1, even grid).
    N2, H2, C2, T2 = 2, 4, 64, 128
    qkv_mid = jax.random.normal(k2, (N2, H2 * 3 * C2, T2), dtype=jnp.float32)
    out_mid = qkv_attention(qkv_mid, n_heads=H2)
    jax.block_until_ready(out_mid)
    ref_mid = _reference(qkv_mid, n_heads=H2)
    assert out_mid.shape == (N2, H2 * C2, T2)
    assert jnp.allclose(out_mid, ref_mid, atol=2e-2, rtol=2e-2)

    # 3) Key-tiled online-softmax (flash) path, forced so it is exercised even
    #    on 128 MiB-VMEM parts.
    N3, H3, C3, T3 = 1, 2, 32, 512
    qkv_big = jax.random.normal(k3, (N3, H3 * 3 * C3, T3), dtype=jnp.float32)
    out_big = qkv_attention(qkv_big, n_heads=H3, force_flash=True)
    jax.block_until_ready(out_big)
    ref_big = _reference(qkv_big, n_heads=H3)
    assert out_big.shape == (N3, H3 * C3, T3)
    assert jnp.allclose(out_big, ref_big, atol=2e-2, rtol=2e-2)

    print("KERNEL_OK")
</pallas_src>

<mosaic_0001>
module attributes {stable_mosaic.version = 11 : i64} {
  func.func @_dense_attn_kernel(%arg0: i32, %arg1: memref<2x1x4x8xf32, #tpu.memory_space<vmem>>, %arg2: memref<2x1x4x8xf32, #tpu.memory_space<vmem>>, %arg3: memref<2x1x4x8xf32, #tpu.memory_space<vmem>>, %arg4: memref<2x4x8xf32, #tpu.memory_space<vmem>>) attributes {dimension_semantics = [#tpu.dimension_semantics<parallel>], iteration_bounds = array<i64: 2>, scalar_prefetch = 0 : i64, scratch_operands = 0 : i64, tpu.core_type = #tpu.core_type<tc>, window_params = [{transform_indices = @transform_0, window_bounds = array<i64: 2, 1, 4, 8>}, {transform_indices = @transform_1, window_bounds = array<i64: 2, 1, 4, 8>}, {transform_indices = @transform_2, window_bounds = array<i64: 2, 1, 4, 8>}, {transform_indices = @transform_3, window_bounds = array<i64: 2, 4, 8>}]} {
    %c0 = arith.constant 0 : index
    %c0_0 = arith.constant 0 : index
    %c0_1 = arith.constant 0 : index
    %c0_2 = arith.constant 0 : index
    %0 = vector.load %arg1[%c0, %c0_0, %c0_1, %c0_2] : memref<2x1x4x8xf32, #tpu.memory_space<vmem>>, vector<2x1x4x8xf32>
    %1 = vector.shape_cast %0 : vector<2x1x4x8xf32> to vector<2x4x8xf32>
    %c0_3 = arith.constant 0 : index
    %c0_4 = arith.constant 0 : index
    %c0_5 = arith.constant 0 : index
    %c0_6 = arith.constant 0 : index
    %2 = vector.load %arg2[%c0_3, %c0_4, %c0_5, %c0_6] : memref<2x1x4x8xf32, #tpu.memory_space<vmem>>, vector<2x1x4x8xf32>
    %3 = vector.shape_cast %2 : vector<2x1x4x8xf32> to vector<2x4x8xf32>
    %c0_7 = arith.constant 0 : index
    %c0_8 = arith.constant 0 : index
    %c0_9 = arith.constant 0 : index
    %c0_10 = arith.constant 0 : index
    %4 = vector.load %arg3[%c0_7, %c0_8, %c0_9, %c0_10] : memref<2x1x4x8xf32, #tpu.memory_space<vmem>>, vector<2x1x4x8xf32>
    %5 = vector.shape_cast %4 : vector<2x1x4x8xf32> to vector<2x4x8xf32>
    %cst = arith.constant 5.000000e-01 : f32
    %6 = vector.broadcast %cst : f32 to vector<2x4x8xf32>
    %7 = arith.mulf %1, %6 : vector<2x4x8xf32>
    %cst_11 = arith.constant dense<0.000000e+00> : vector<2x8x8xf32>
    %8 = tpu.matmul %3, %7, %cst_11 {dimension_numbers = #tpu.dot_dimension_numbers<[1], [1], [2], [2], [0, 0, 0, 2, 1, 2], [0], [0]>} : vector<2x4x8xf32>, vector<2x4x8xf32>, vector<2x8x8xf32> -> vector<2x8x8xf32>
    %cst_12 = arith.constant dense<0xFF800000> : vector<2x8xf32>
    %9 = vector.multi_reduction <maximumf>, %8, %cst_12 [1] : vector<2x8x8xf32> to vector<2x8xf32>
    %10 = vector.shape_cast %9 : vector<2x8xf32> to vector<2x1x8xf32>
    %11 = vector.broadcast %10 : vector<2x1x8xf32> to vector<2x8x8xf32>
    %12 = arith.subf %8, %11 : vector<2x8x8xf32>
    %13 = math.exp %12 : vector<2x8x8xf32>
    %cst_13 = arith.constant dense<0.000000e+00> : vector<2x8xf32>
    %14 = vector.multi_reduction <add>, %13, %cst_13 [1] : vector<2x8x8xf32> to vector<2x8xf32>
    %15 = vector.shape_cast %14 : vector<2x8xf32> to vector<2x1x8xf32>
    %cst_14 = arith.constant dense<0.000000e+00> : vector<2x4x8xf32>
    %16 = tpu.matmul %5, %13, %cst_14 {dimension_numbers = #tpu.dot_dimension_numbers<[2], [1], [1], [2], [0, 0, 0, 1, 1, 2], [0], [0]>} : vector<2x4x8xf32>, vector<2x8x8xf32>, vector<2x4x8xf32> -> vector<2x4x8xf32>
    %17 = tpu.reciprocal %15 {approx = true} : vector<2x1x8xf32> -> vector<2x1x8xf32>
    %18 = vector.broadcast %17 : vector<2x1x8xf32> to vector<2x4x8xf32>
    %19 = arith.mulf %16, %18 : vector<2x4x8xf32>
    %c0_15 = arith.constant 0 : index
    %c0_16 = arith.constant 0 : index
    %c0_17 = arith.constant 0 : index
    %20 = vector.load %arg4[%c0_15, %c0_16, %c0_17] : memref<2x4x8xf32, #tpu.memory_space<vmem>>, vector<2x4x8xf32>
    tpu.vector_store %arg4[%c0_15, %c0_16, %c0_17], %19 {strides = array<i32>} : memref<2x4x8xf32, #tpu.memory_space<vmem>>, vector<2x4x8xf32>,
    return
  }
  func.func @transform_0(%arg0: i32) -> (i32, i32, i32, i32) {
    %c0_i32 = arith.constant 0 : i32
    %c0_i32_0 = arith.constant 0 : i32
    %c0_i32_1 = arith.constant 0 : i32
    %c0_i32_2 = arith.constant 0 : i32
    return %arg0, %c0_i32, %c0_i32_0, %c0_i32_1 : i32, i32, i32, i32
  }
  func.func @transform_1(%arg0: i32) -> (i32, i32, i32, i32) {
    %c1_i32 = arith.constant 1 : i32
    %c0_i32 = arith.constant 0 : i32
    %c0_i32_0 = arith.constant 0 : i32
    %c0_i32_1 = arith.constant 0 : i32
    return %arg0, %c1_i32, %c0_i32, %c0_i32_0 : i32, i32, i32, i32
  }
  func.func @transform_2(%arg0: i32) -> (i32, i32, i32, i32) {
    %c2_i32 = arith.constant 2 : i32
    %c0_i32 = arith.constant 0 : i32
    %c0_i32_0 = arith.constant 0 : i32
    %c0_i32_1 = arith.constant 0 : i32
    return %arg0, %c2_i32, %c0_i32, %c0_i32_0 : i32, i32, i32, i32
  }
  func.func @transform_3(%arg0: i32) -> (i32, i32, i32) {
    %c0_i32 = arith.constant 0 : i32
    %c0_i32_0 = arith.constant 0 : i32
    %c0_i32_1 = arith.constant 0 : i32
    return %arg0, %c0_i32, %c0_i32_0 : i32, i32, i32
  }
}

</mosaic_0001>

<bundles_post_ra>
// kernel: tpu_custom_call.1
= control target key start
LH: loop header
LB: loop body
LE: loop exit
PB: predicated region body
PF: predicated region fallthrough
CT: control target
= control target key end

     0   :  { %s1394_s0 = inlined_call_operand.hbm [shape: f32[4,3,4,8], index: 0, kind: input, shape index: {}]   ;;  %s1395_s1 = inlined_call_operand.hbm [shape: f32[4,3,4,8], index: 1, kind: input, shape index: {}]   ;;  %s1396_s2 = inlined_call_operand.hbm [shape: f32[4,3,4,8], index: 2, kind: input, shape index: {}]   ;;  %s1397_s3 = inlined_call_operand.hbm [shape: f32[4,4,8], index: 3, kind: output, shape index: {}]  }
   0x1   :  { %1407 = sst [smem:[#allocation14_spill]] %s1394_s0 }
   0x2   :  { %1408 = sst [smem:[#allocation15_spill]] %s1395_s1 }
   0x3   :  { %8 = vsyncpa [#allocation3], 0 }
   0x4   :  { %10 = vsyncpa [#allocation3 + $0x1], 0 }
   0x5   :  { %11 = vsyncpa [#allocation6], 0 }
   0x6   :  { %13 = vsyncpa [#allocation6 + $0x1], 0 }
   0x7   :  { %14 = vsyncpa [#allocation4], 0 }
   0x8   :  { %16 = vsyncpa [#allocation4 + $0x1], 0  ;;  %s1138_s12 = smov 0   ;;  %s1140_s13 = smov 0  }
   0x9   :  { %s1142_s14 = smov 0   ;;  %s1144_s15 = smov 0  }
   0xa LB: > { %1409 = sst [smem:[#allocation12_spill]] %s1101_s14  ;;  %s1159_s16 = sadd.s32 4294967295, %s1105_s15   ;;  %s1105_s15 = sphi %s1144_s15, %s1432_s15   ;;  %s1101_s14 = sphi %s1142_s14, %s1429_s14   ;;  %s1097_s13 = sphi %s1140_s13, %s1431_s13   ;;  %s1093_s12 = sphi %s1138_s12, %s1430_s12  }
   0xb   : > { %s823_s17 = sadd.s32 4294967294, %s1105_s15   ;;  %s1163_s18 = sadd.s32 1, %s1105_s15  }
   0xc   : > { %s29_s19 = sadd.s32 1, %s1101_s14  ;;  %s26_s20 = ssub.s32 %s1105_s15, %s1163_s18 }
   0xd   : > { %p36_p0 = scmp.ne.s32.totalorder %s1101_s14, %s1097_s13  ;;  %p27_p1 = scmp.eq.s32.totalorder %s26_s20, 0 }
   0xe   : > { %p37_p2 = scmp.eq.s32.totalorder %s1105_s15, 0  ;;  %p42_p3 = scmp.ne.s32.totalorder %s1097_s13, %s1093_s12 }
   0xf   : > { %p43_p4 = scmp.eq.s32.totalorder %s1159_s16, 0  ;;  %p118_p7 = scmp.eq.s32.totalorder %s1159_s16, 1 }
  0x10   : > { %s1175_s21 = scalar_select %p27_p1, %s1101_s14, %s29_s19  }
  0x11   : > { %p38_p5 = por %p37_p2, %p36_p0  ;;  %p1177_p6 = por %p43_p4, %p42_p3 }
  0x12   : > { %1410 = sst [smem:[#allocation13_spill]] %s1175_s21  ;;  %p124_p8 = scmp.eq.s32.totalorder %s823_s17, 1 }
  0x13   : > { %s1411_s22 = scalar_select %p1177_p6, 1, 0 }
  0x14   : > { %p902_p10 = scmp.lt.s32.totalorder %s1105_s15, 2  ;;  %p1184_p11 = por %p118_p7, %p36_p0 }
  0x15   : > { %p1188_p12 = por %p124_p8, %p42_p3  ;;  %s144_s25 = sand.u32 1, %s1101_s14  }
  0x16   : > { %s1412_s23 = scalar_select %p1184_p11, 1, 0 }
  0x17   : > { %s1413_s24 = scalar_select %p1188_p12, 1, 0 }
  0x18   : > { %s1194_s26 = smul.u32 384, %s1105_s15  ;;  %s1198_s27 = sshll.u32 %s144_s25, 3 }
  0x19   : > { %p1200_p13 = pnand %p902_p10, %p38_p5  ;;  %s166_s29 = sand.u32 1, %s1105_s15  }
  0x1a   : > { %s1415_s1 = sld [smem:[#allocation15_spill]]  ;;  %s170_s7 = scalar_lea.vmem [#allocation5], %s1198_s27 }
  0x1b   : > { %s179_s8 = sshll.u32 %s170_s7, 4  ;;  %s1215_s9 = scalar_lea.sflag [#allocation6], %s166_s29  ;;  %s1212_s8 = int_to_ptr.vmem [resolvable:$true] %s179_s8 }
  0x1c   : > { %p1220_p2 = pneg %p1200_p13 }
  0x20   : > { %s743_s5 = scalar_lea.hbm %s1415_s1, %s1194_s26  ;;  %s956_s20 = scalar_lea.hbm %s1415_s1, 768 }
  0x21   : > { %s1209_s6 = scalar_lea.hbm %s743_s5, 64  ;;  %s979_s10 = scalar_lea.hbm %s743_s5, 192 }
  0x22   : > { %p952_p1 = scmp.ne.s32.totalorder %s1209_s6, %s979_s10  ;;  %p957_p5 = scmp.lt.s32.totalorder %s1209_s6, %s1415_s1 }
  0x23   : > { %p958_p7 = scmp.lt.s32.totalorder %s956_s20, %s979_s10 }
  0x24   : > { %p954_p3 = pnand %p1220_p2, %p952_p1 }
  0x25   : > { %p959_p8 = por %p958_p7, %p957_p5 }
  0x26   : > { %p955_p4 = pneg %p954_p3 }
  0x28   : > { %p960_p10 = pnand %p959_p8, %p955_p4 }
  0x2a   : > { %963 = shalt.err (!%p960_p10)
}
  0x2b   : > { %s964_s29 = scalar_lea.vmem %s1212_s8, 128  ;;  %s1107_s5 = smov [#allocation5]  }
  0x2c   : > { %p965_p9 = scmp.ne.s32.totalorder %s1212_s8, %s964_s29  ;;  %s969_s7 = sshll.u32 %s1107_s5, 4  ;;  %s970_s7 = int_to_ptr.vmem [resolvable:$false] %s969_s7 }
  0x2d   : > { %s971_s17 = scalar_lea.vmem %s970_s7, 256  ;;  %p972_p0 = scmp.lt.s32.totalorder %s1212_s8, %s970_s7 }
  0x2e   : > { %p967_p1 = pnand %p965_p9, %p1220_p2  ;;  %p973_p12 = scmp.lt.s32.totalorder %s971_s17, %s964_s29 }
  0x30   : > { %p968_p3 = pneg %p967_p1  ;;  %p974_p11 = por %p973_p12, %p972_p0 }
  0x32   : > { %p975_p6 = pnand %p974_p11, %p968_p3 }
  0x34   : > { %978 = shalt.err (!%p975_p6)
}
  0x35   : > { %s1400_s10 = smov 192   ;;  %s1402_s19 = smov 64  }
  0x36   : > { %s1404_s20 = smov 4   ;;  %p210_p9 = scmp.lt.s32.totalorder %s1105_s15, 3 }
  0x37   : > { %894 = dma.hbm_to_vmem [thread:$0]  (!%p1200_p13), %s1209_s6, 128, %s1212_s8, %s1215_s9, %s1400_s10, %s1402_s19, %s1404_s20  }
  0x38   : > { %s1417_s0 = sld [smem:[#allocation14_spill]]  ;;  %p1418_p6 = scmp.ge.s32.totalorder %s1105_s15, 1 }
  0x39   : > { %s148_s7 = scalar_lea.vmem [#allocation2], %s1198_s27  ;;  %s145_s6 = scalar_lea.sflag [#allocation3], %s144_s25 }
  0x3a   : > { %p1255_p11 = pnand %p1418_p6, %p210_p9  ;;  %s156_s17 = sshll.u32 %s148_s7, 4  ;;  %s1260_s17 = int_to_ptr.vmem [resolvable:$true] %s156_s17 }
  0x3c   : > { %s1419_s5 = scalar_select %p1255_p11, 1, 0 }
  0x3e   : > { %s1251_s29 = scalar_lea.hbm %s1417_s0, %s1194_s26  ;;  %s985_s10 = scalar_lea.hbm %s1417_s0, 768 }
  0x3f   : > { %s980_s8 = scalar_lea.hbm %s1251_s29, 128  ;;  %p986_p5 = scmp.lt.s32.totalorder %s1251_s29, %s1417_s0 }
  0x40   : > { %p981_p12 = scmp.ne.s32.totalorder %s1251_s29, %s980_s8  ;;  %p987_p7 = scmp.lt.s32.totalorder %s985_s10, %s980_s8 }
  0x42   : > { %p983_p0 = pnand %p981_p12, %p1220_p2  ;;  %p988_p8 = por %p987_p7, %p986_p5 }
  0x44   : > { %p984_p4 = pneg %p983_p0 }
  0x46   : > { %p989_p10 = pnand %p988_p8, %p984_p4 }
  0x48   : > { %992 = shalt.err (!%p989_p10)
}
  0x49   : > { %s993_s25 = scalar_lea.vmem %s1260_s17, 128  ;;  %s1111_s7 = smov [#allocation2]  }
  0x4a   : > { %p994_p1 = scmp.ne.s32.totalorder %s1260_s17, %s993_s25  ;;  %s998_s30 = sshll.u32 %s1111_s7, 4  ;;  %s999_s30 = int_to_ptr.vmem [resolvable:$false] %s998_s30 }
  0x4b   : > { %s1000_s4 = scalar_lea.vmem %s999_s30, 256  ;;  %p1001_p6 = scmp.lt.s32.totalorder %s1260_s17, %s999_s30 }
  0x4c   : > { %p996_p3 = pnand %p994_p1, %p1220_p2  ;;  %p1002_p12 = scmp.lt.s32.totalorder %s1000_s4, %s993_s25 }
  0x4e   : > { %p997_p9 = pneg %p996_p3  ;;  %p1003_p0 = por %p1002_p12, %p1001_p6 }
  0x50   : > { %p1004_p11 = pnand %p1003_p0, %p997_p9 }
  0x52   : > { %1007 = shalt.err (!%p1004_p11)
}
  0x53   : > { %s1420_s10 = smov 4   ;;  %s1421_s19 = smov 64  }
  0x54   : > { %s1422_s20 = smov 192   ;;  %s750_s0 = scalar_lea.hbm %s1396_s2, %s1194_s26 }
  0x55   : > { %891 = dma.hbm_to_vmem [thread:$0]  (!%p1200_p13), %s1251_s29, 128, %s1260_s17, %s145_s6, %s1422_s20, %s1421_s19, %s1420_s10  }
  0x56   : > { %s193_s30 = scalar_lea.vmem [#allocation7], %s1198_s27  ;;  %s1292_s4 = scalar_lea.hbm %s750_s0, 128 }
  0x57   : > { %s202_s25 = sshll.u32 %s193_s30, 4  ;;  %s1036_s1 = scalar_lea.hbm %s750_s0, 256  ;;  %s203_s25 = int_to_ptr.vmem [resolvable:$true] %s202_s25 }
  0x58   : > { %p1009_p11 = scmp.ne.s32.totalorder %s1292_s4, %s1036_s1  ;;  %s1013_s29 = scalar_lea.hbm %s1396_s2, 768 }
  0x59   : > { %p1014_p7 = scmp.lt.s32.totalorder %s1292_s4, %s1396_s2  ;;  %p1015_p8 = scmp.lt.s32.totalorder %s1013_s29, %s1036_s1 }
  0x5a   : > { %p1011_p4 = pnand %p1009_p11, %p1220_p2 }
  0x5b   : > { %p1016_p10 = por %p1015_p8, %p1014_p7 }
  0x5c   : > { %p1012_p5 = pneg %p1011_p4 }
  0x5e   : > { %p1017_p1 = pnand %p1016_p10, %p1012_p5 }
  0x60   : > { %1020 = shalt.err (!%p1017_p1)
}
  0x61   : > { %s1021_s26 = scalar_lea.vmem %s203_s25, 128  ;;  %s1112_s0 = smov [#allocation7]  }
  0x62   : > { %p1022_p3 = scmp.ne.s32.totalorder %s203_s25, %s1021_s26  ;;  %s1026_s27 = sshll.u32 %s1112_s0, 4  ;;  %s1027_s27 = int_to_ptr.vmem [resolvable:$false] %s1026_s27 }
  0x63   : > { %s1028_s8 = scalar_lea.vmem %s1027_s27, 256  ;;  %p1029_p12 = scmp.lt.s32.totalorder %s203_s25, %s1027_s27 }
  0x64   : > { %p1024_p9 = pnand %p1022_p3, %p1220_p2  ;;  %p1030_p0 = scmp.lt.s32.totalorder %s1028_s8, %s1021_s26 }
  0x66   : > { %p1025_p6 = pneg %p1024_p9  ;;  %p1031_p11 = por %p1030_p0, %p1029_p12 }
  0x68   : > { %p1032_p4 = pnand %p1031_p11, %p1025_p6 }
  0x6a   : > { %1035 = shalt.err (!%p1032_p4)
}
  0x6b   : > { %897 = dma.hbm_to_vmem [thread:$0]  (!%p1200_p13), %s1292_s4, 128, %s203_s25, %s1215_s9, %s1422_s20, %s1421_s19, %s1420_s10  }
  0x6c   : > { %p1423_p2 = scmp.ne.s32.totalorder %s1419_s5, 0 }
  0x6d   : > { %s1316_s1 = sand.u32 (!%p1423_p2), 1, %s1097_s13   ;;  %p1424_p5 = scmp.ne.s32.totalorder (!%p1423_p2), %s1411_s22, 0 }
  0x6e   : > { %214 = sbr.rel (%p1423_p2) target bundleno = 685 (0x2ad), region = 32  ;;  %s1319_s14 = sshll.u32 (!%p1423_p2), %s1316_s1, 3 }
  0x6f   : > { %s217_s21 = scalar_lea.sflag (!%p1423_p2), [#allocation3], %s1316_s1  ;;  %s220_s28 = scalar_lea.vmem (!%p1423_p2), [#allocation2], %s1319_s14 }
  0x73   : > { %1080 = dma.done.wait (%p1424_p5), %s217_s21, 128  }
  0x74   : > { %1082 = vsyncadd (%p1424_p5), %s217_s21, 4294967168  ;;  %s225_s9 = sand.u32 1, %s1159_s16   ;;  %s229_s5 = scalar_lea.vmem [#allocation5], %s1319_s14 }
  0x75   : > { %s226_s11 = scalar_lea.sflag [#allocation6], %s225_s9 }
  0x76   : > { %1084 = dma.done.wait (%p1424_p5), %s226_s11, 256  }
  0x77   : > { %1086 = vsyncadd (%p1424_p5), %s226_s11, 4294967040  ;;  %v1113_v0 = vmov 0.0   ;;  %vm1114_vm0 = vmmov 0   ;;  %v277_v1 = vld [vmem:[%s229_s5] sm:$0xf]  ;;  %vm319_vm1 = vcmask 1043456  }
  0x78   : > { %859 = vmatprep.subr.mxu0 %v1113_v0  ;;  %861 = vmatprep.mubr.msk.f32.mxu0 %vm1114_vm0, %v1113_v0  ;;  %v275_v2 = vld [vmem:[%s220_s28] sm:$0xf]  ;;  %v276_v4 = vld [vmem:[%s220_s28 + $0x4] sm:$0xf]  ;;  %v278_v5 = vld [vmem:[%s229_s5 + $0x4] sm:$0xf] }
  0x79   : > { %864 = vmatprep.subr.mxu1 %v1113_v0  ;;  %866 = vmatprep.mubr.msk.f32.mxu1 %vm1114_vm0, %v1113_v0  ;;  %v281_v3 = vmul.f32 0.5, %v275_v2  ;;  %v282_v6 = vmul.f32 0.5, %v276_v4  ;;  %vm315_vm2 = vcmask 31744   ;;  %vm501_vm3 = vcmask 64512   ;;  %s238_s22 = scalar_lea.vmem [#allocation7], %s1319_s14  ;;  %s270_s10 = scalar_lea.vmem [#allocation8], %s1319_s14 }
  0x7a   : > { %283 = vxpose.xlu0.b32.start.end [1/1] (short) (narrow) %v277_v1, 8  ;;  %v279_v31 = vld [vmem:[%s238_s22] sm:$0xf]  ;;  %v280_v34 = vld [vmem:[%s238_s22 + $0x4] sm:$0xf]  ;;  %vm686_vm4 = vcmask 60416  }
  0x7b   : > { %860 = vmatpush3.msk.msra.mxu0 %vm319_vm1, %v281_v3  ;;  %865 = vmatpush3.msk.msra.mxu1 %vm319_vm1, %v282_v6  ;;  %s703_s19 = sshll.u32 %s270_s10, 4  ;;  %s850_s20 = sshll.u32 %s1159_s16, 7  ;;  %s1346_s19 = int_to_ptr.vmem [resolvable:$true] %s703_s19 }
  0x7c   : > { %869 = vmatprep.subr.mxu0 %v1113_v0  ;;  %874 = vmatprep.subr.mxu1 %v1113_v0  ;;  %s1351_s25 = scalar_lea.hbm %s1397_s3, %s850_s20  ;;  %s690_s4 = scalar_lea.sflag [#allocation4], %s1316_s1 }
  0x7d   : > { %s1037_s29 = scalar_lea.vmem %s1346_s19, 128  ;;  %p1425_p7 = scmp.ne.s32.totalorder %s1412_s23, 0 }
  0x7e   : > { %393 = vxpose.xlu0.b32.start.end [1/1] (short) (narrow) %v278_v5, 8  ;;  %p1038_p13 = scmp.ne.s32.totalorder %s1346_s19, %s1037_s29  ;;  %s1115_s16 = smov [#allocation8]  }
  0x7f   : > { %s1041_s17 = sshll.u32 %s1115_s16, 4  ;;  %s1042_s17 = int_to_ptr.vmem [resolvable:$false] %s1041_s17 }
  0x80   : > { %p1039_p8 = pnand %p1038_p13, %p1425_p7  ;;  %s1043_s6 = scalar_lea.vmem %s1042_s17, 256 }
  0x81   : > { %p1044_p1 = scmp.lt.s32.totalorder %s1346_s19, %s1042_s17  ;;  %p1045_p3 = scmp.lt.s32.totalorder %s1043_s6, %s1037_s29 }
  0x82   : > { %p1040_p10 = pneg %p1039_p8 }
  0x83   : > { %p1046_p9 = por %p1045_p3, %p1044_p1 }
  0x85   : > { %p1047_p6 = pnand %p1046_p9, %p1040_p10 }
  0xf6   : > { %v299_v7 = vpop.trf.xlu0 }
  0xf7   : > { %862 = vmatmul.mubr.msk.f32.vlgmr.msra.gmra.mxu0 %vm315_vm2, %v299_v7 }
  0xf8   : > { %871 = vmatprep.mubr.msk.f32.mxu0 %vm1114_vm0, %v1113_v0 }
  0xfa   : > { %v409_v8 = vpop.trf.xlu0 }
  0xfb   : > { %867 = vmatmul.mubr.msk.f32.vlgmr.msra.gmra.mxu1 %vm315_vm2, %v409_v8 }
  0xfc   : > { %876 = vmatprep.mubr.msk.f32.mxu1 %vm1114_vm0, %v1113_v0 }
 0x1b7   : > { %v389_v9 = vpop.f32.mrf.mxu0 }
 0x1b8   : > { %v502_v10 = vsel %vm501_vm3, %v389_v9, -inf }
 0x1b9   : > { %v503_v11 = vrot.slane %v502_v10, 4  ;;  %v863_v12 = vpop.f32.mrf.mxu0 }
 0x1bb   : > { %v504_v13 = vmax.f32 %v502_v10, %v503_v11  ;;  %v497_v14 = vpop.f32.mrf.mxu1 }
 0x1bc   : > { %v509_v15 = vsel %vm501_vm3, %v497_v14, -inf }
 0x1bd   : > { %v505_v16 = vrot.slane %v504_v13, 2  ;;  %v510_v17 = vrot.slane %v509_v15, 4  ;;  %v868_v18 = vpop.f32.mrf.mxu1 }
 0x1bf   : > { %v506_v19 = vmax.f32 %v504_v13, %v505_v16  ;;  %v511_v20 = vmax.f32 %v509_v15, %v510_v17 }
 0x1c1   : > { %v507_v21 = vrot.slane %v506_v19, 1  ;;  %v512_v22 = vrot.slane %v511_v20, 2 }
 0x1c3   : > { %v508_v23 = vmax.f32 %v506_v19, %v507_v21  ;;  %v513_v24 = vmax.f32 %v511_v20, %v512_v22 }
 0x1c5   : > { %v516_v25 = vsub.f32 %v389_v9, %v508_v23  ;;  %v514_v26 = vrot.slane %v513_v24, 1 }
 0x1c7   : > { %v518_v27 = vmul.f32 1.442695, %v516_v25  ;;  %v515_v28 = vmax.f32 %v513_v24, %v514_v26 }
 0x1c9   : > { %943 = vpow2.f32 %v518_v27  ;;  %v517_v29 = vsub.f32 %v497_v14, %v515_v28 }
 0x1cb   : > { %v520_v30 = vmul.f32 1.442695, %v517_v29 }
 0x1cd   : > { %945 = vpow2.f32 %v520_v30 }
 0x1d6   : > { %v944_v32 = vpop.eup %943 }
 0x1d7   : > { %v522_v33 = vsel %vm501_vm3, %v944_v32, 0.0  ;;  %870 = vmatpush3.msra.mxu0 %v944_v32 }
 0x1d8   : > { %872 = vmatmul.mubr.msk.f32.vlgmr.msra.gmra.mxu0 %vm501_vm3, %v279_v31  ;;  %v523_v37 = vrot.slane %v522_v33, 4 }
 0x1da   : > { %v946_v35 = vpop.eup %945  ;;  %v524_v38 = vadd.f32 %v523_v37, %v522_v33 }
 0x1db   : > { %v529_v36 = vsel %vm501_vm3, %v946_v35, 0.0  ;;  %875 = vmatpush3.msra.mxu1 %v946_v35 }
 0x1dc   : > { %877 = vmatmul.mubr.msk.f32.vlgmr.msra.gmra.mxu1 %vm501_vm3, %v280_v34  ;;  %v530_v39 = vrot.slane %v529_v36, 4  ;;  %v525_v41 = vrot.slane %v524_v38, 2 }
 0x1de   : > { %v531_v40 = vadd.f32 %v530_v39, %v529_v36  ;;  %v526_v42 = vadd.f32 %v525_v41, %v524_v38 }
 0x1e0   : > { %v532_v43 = vrot.slane %v531_v40, 2  ;;  %v527_v44 = vrot.slane %v526_v42, 1 }
 0x1e2   : > { %v533_v45 = vadd.f32 %v532_v43, %v531_v40  ;;  %v528_v46 = vadd.f32 %v527_v44, %v526_v42 }
 0x1e4   : > { %v534_v47 = vrot.slane %v533_v45, 1  ;;  %947 = vrcp.f32 %v528_v46 }
 0x1e6   : > { %v535_v48 = vadd.f32 %v534_v47, %v533_v45 }
 0x1e8   : > { %949 = vrcp.f32 %v535_v48 }
 0x1f1   : > { %v948_v49 = vpop.eup %947 }
 0x1f5   : > { %v950_v53 = vpop.eup %949 }
 0x298   : > { %v605_v50 = vpop.f32.mrf.mxu0 }
 0x299   : > { %v684_v51 = vmul.f32 %v948_v49, %v605_v50 }
 0x29a   : > { %v873_v52 = vpop.f32.mrf.mxu0 }
 0x29b   : > { %687 = vst.msk [vmem:[%s270_s10] sm:$0xf] %vm686_vm4, %v684_v51 }
 0x29c   : > { %v678_v54 = vpop.f32.mrf.mxu1 }
 0x29d   : > { %v685_v55 = vmul.f32 %v950_v53, %v678_v54 }
 0x29e   : > { %v878_v56 = vpop.f32.mrf.mxu1 }
 0x29f   : > { %688 = vst.msk [vmem:[%s270_s10 + $0x4] sm:$0xf] %vm686_vm4, %v685_v55 }
 0x2a0   : > { %1050 = shalt.err (!%p1047_p6)
}
 0x2a1   : > { %s1051_s26 = scalar_lea.hbm %s1351_s25, 128  ;;  %s1055_s8 = scalar_lea.hbm %s1397_s3, 256 }
 0x2a2   : > { %p1052_p12 = scmp.ne.s32.totalorder %s1351_s25, %s1051_s26  ;;  %p1056_p4 = scmp.lt.s32.totalorder %s1351_s25, %s1397_s3 }
 0x2a3   : > { %p1057_p2 = scmp.lt.s32.totalorder %s1055_s8, %s1051_s26 }
 0x2a4   : > { %p1053_p0 = pnand %p1052_p12, %p1425_p7 }
 0x2a5   : > { %p1058_p5 = por %p1057_p2, %p1056_p4 }
 0x2a6   : > { %p1054_p11 = pneg %p1053_p0 }
 0x2a8   : > { %p1059_p13 = pnand %p1058_p5, %p1054_p11 }
 0x2aa   : > { %1062 = shalt.err (!%p1059_p13)
}
 0x2ab   : > { %s1116_s28 = smov 64   ;;  %s1117_s9 = smov 4  }
 0x2ac   : > { %886 = dma.vmem_to_hbm [thread:$0]  (%p1425_p7), %s1346_s19, 128, %s1351_s25, %s690_s4, %s1116_s28, %s1116_s28, %s1117_s9  }
 0x2ad PF: > { %s718_s11 = sand.u32 1, %s1093_s12   ;;  %p1426_p8 = scmp.ne.s32.totalorder %s1413_s24, 0 }
 0x2ae   : > { %p1427_p10 = scmp.ge.s32.totalorder %s1105_s15, 2  ;;  %s719_s5 = scalar_lea.sflag [#allocation4], %s718_s11 }
 0x2b0   : > { %p899_p1 = pnand %p1427_p10, %p1426_p8 }
 0x2b2   : > { %p900_p3 = pneg %p899_p1 }
 0x2b4   : > { %1088 = dma.done.wait (%p900_p3), %s719_s5, 128  }
 0x2b5   : > { %1090 = vsyncadd (%p900_p3), %s719_s5, 4294967168  ;;  %s1428_s22 = sld [smem:[#allocation12_spill]]  ;;  %p19_p9 = scmp.ge.s32.totalorder %s1163_s18, 4  }
 0x2b6   : > { %s1429_s14 = sld [smem:[#allocation13_spill]]  ;;  %s1430_s12 = smov %s1097_s13 }
 0x2b7   : > { %s1432_s15 = smov %s1163_s18  ;;  %21 = sbr.rel (!%p19_p9) target bundleno = 10 (0xa), region = 101 }
 0x2bb   : > { %s1431_s13 = smov %s1428_s22 }
 0x2bc   :  { %724 = vsyncpa [#allocation3], 1 }
 0x2bd   :  { %726 = vsyncpa [#allocation3 + $0x1], 1 }
 0x2be   :  { %727 = vsyncpa [#allocation6], 1 }
 0x2bf   :  { %729 = vsyncpa [#allocation6 + $0x1], 1 }
 0x2c0   :  { %730 = vsyncpa [#allocation4], 1 }
 0x2c1   :  { %732 = vsyncpa [#allocation4 + $0x1], 1 }

</bundles_post_ra>
